<compile_context>
chip_gen: v5e
topology: v5e:2x2
jax: 0.10.0
libtpu: 0.0.40
codegen_flags: <defaults>
</compile_context>

<pallas_src>
import jax
import jax.numpy as jnp
from jax.experimental import pallas as pl
from jax.experimental.pallas import tpu as pltpu

# ---------------- model hyperparameters (small, consistent with module) -----
B, C, H, W = 2, 4, 16, 16          # batch, channels, spatial
NUM_STREAMS = 2                    # vision_model.num_streams
NUM_FEATURES = 16                  # vision_model.num_features
EMBED_DIM = NUM_STREAMS * NUM_FEATURES   # 32
NUM_CUBES = 3                      # data_stats['num_cubes']
OUT_DIM = 3 * NUM_CUBES            # 9
IN_DIM = C * H * W                 # 1024

LANES = 128                        # lane-dense padding for small params/output
PACK_ROWS = 40                     # >= EMBED_DIM + 2, multiple of 8 sublanes


def pose_kernel(x_ref, w01_ref, pk_ref, out_ref):
    """Fused (vision+fc1 folded): relu(x @ W01 + b01) @ w2 + b2.

    x_ref   : (B, IN_DIM)            bf16
    w01_ref : (IN_DIM, EMBED_DIM)    bf16   (= wv @ w1, folded offline)
    pk_ref  : (PACK_ROWS, LANES)     f32 packed small params:
                rows [0, EMBED_DIM)        -> w2 (lane-padded to 128)
                row  EMBED_DIM, cols<EMBED -> b01
                row  EMBED_DIM+1           -> b2 (lane-padded, zeros beyond 9)
    out_ref : (B, LANES)             f32 lane-dense (first OUT_DIM cols valid)
    """
    w2p = pk_ref[0:EMBED_DIM, :]                                  # (32, 128)
    b01 = pk_ref[EMBED_DIM:EMBED_DIM + 1, 0:EMBED_DIM]            # (1, 32)
    b2p = pk_ref[EMBED_DIM + 1:EMBED_DIM + 2, :]                  # (1, 128)

    h = jnp.dot(x_ref[...], w01_ref[...],
                preferred_element_type=jnp.float32) + b01         # (B, 32) f32
    h = jnp.maximum(h, 0.0)                                       # ReLU (f32)
    out_ref[...] = jnp.dot(h, w2p,
                           preferred_element_type=jnp.float32) + b2p


def prepare_params(params):
    """One-time offline fold + pack of the raw module parameters."""
    wv, bv, w1, b1, w2, b2 = params

    # Exact fold of (linear) vision projection into fc1.
    w01 = wv @ w1                          # (IN_DIM, EMBED_DIM)
    b01 = bv @ w1 + b1                     # (1, EMBED_DIM)

    # Pack the small params into one lane-dense f32 block (single DMA).
    pk = jnp.zeros((PACK_ROWS, LANES), jnp.float32)
    pk = pk.at[0:EMBED_DIM, 0:OUT_DIM].set(w2)
    pk = pk.at[EMBED_DIM, 0:EMBED_DIM].set(b01[0])
    pk = pk.at[EMBED_DIM + 1, 0:OUT_DIM].set(b2[0])

    return w01.astype(jnp.bfloat16), pk


def pose_model_forward(im, prepared):
    """im: (B, C, H, W) float32 NCHW. Returns {'pose': (B, 3*num_cubes)}."""
    w01_bf, pk = prepared
    b = im.shape[0]
    x = im.reshape(b, -1).astype(jnp.bfloat16)                    # (B, IN_DIM)

    vmem = pl.BlockSpec(memory_space=pltpu.MemorySpace.VMEM)
    out = pl.pallas_call(
        pose_kernel,
        out_shape=jax.ShapeDtypeStruct((b, LANES), jnp.float32),
        in_specs=[vmem, vmem, vmem],
        out_specs=vmem,
    )(x, w01_bf, pk)

    pose = out[:, :OUT_DIM]                                       # (B, 9)
    return {"pose": pose}


def init_params(key):
    """Deterministic parameter init (synthetic; shapes follow __init__)."""
    k = jax.random.split(key, 6)
    wv = jax.random.normal(k[0], (IN_DIM, EMBED_DIM), jnp.float32) * 0.02
    bv = jax.random.normal(k[1], (1, EMBED_DIM), jnp.float32) * 0.01
    # Mlp(embed_dim, out_features=3*num_cubes): fc1 = embed->embed, fc2 = embed->out
    w1 = jax.random.normal(k[2], (EMBED_DIM, EMBED_DIM), jnp.float32) * 0.1
    b1 = jax.random.normal(k[3], (1, EMBED_DIM), jnp.float32) * 0.01
    w2 = jax.random.normal(k[4], (EMBED_DIM, OUT_DIM), jnp.float32) * 0.1
    b2 = jax.random.normal(k[5], (1, OUT_DIM), jnp.float32) * 0.01
    return wv, bv, w1, b1, w2, b2


def reference_forward(im, params):
    """Pure-JAX f32 reference of the original (unfolded) module."""
    wv, bv, w1, b1, w2, b2 = params
    x = im.reshape(im.shape[0], -1)
    h = x @ wv + bv              # synthetic vision model -> (B, embed_dim)
    h = h @ w1 + b1              # rearrange 'b n y -> b (n y)' is identity here
    h = jnp.maximum(h, 0.0)
    return h @ w2 + b2


if __name__ == "__main__":
    key = jax.random.PRNGKey(0)
    k_im, k_params = jax.random.split(key)
    im = jax.random.normal(k_im, (B, C, H, W), jnp.float32)
    params = init_params(k_params)
    prepared = prepare_params(params)

    pred = jax.jit(pose_model_forward)(im, prepared)
    pose = jax.block_until_ready(pred["pose"])

    ref = reference_forward(im, params)
    assert pose.shape == (B, OUT_DIM)
    # Loose tolerance accounts for the bf16 cast of x / W01 (f32 accumulation).
    assert jnp.allclose(pose, ref, rtol=1e-2, atol=1e-2), "mismatch vs reference"

    # TODO(synk): process_output() denormalization depends on data_stats['target_pos']
    # statistics which are external data; not part of the forward kernel.
    print("KERNEL_OK")
</pallas_src>

<mosaic_0001>
module attributes {stable_mosaic.version = 11 : i64} {
  func.func @pose_kernel(%arg0: memref<2x1024xbf16, #tpu.memory_space<vmem>>, %arg1: memref<1024x32xbf16, #tpu.memory_space<vmem>>, %arg2: memref<40x128xf32, #tpu.memory_space<vmem>>, %arg3: memref<2x128xf32, #tpu.memory_space<vmem>>) attributes {dimension_semantics = [], scalar_prefetch = 0 : i64, scratch_operands = 0 : i64, tpu.core_type = #tpu.core_type<tc>} {
    %c0 = arith.constant 0 : index
    %c0_0 = arith.constant 0 : index
    %0 = vector.load %arg2[%c0, %c0_0] : memref<40x128xf32, #tpu.memory_space<vmem>>, vector<32x128xf32>
    %c32 = arith.constant 32 : index
    %c0_1 = arith.constant 0 : index
    %1 = vector.load %arg2[%c32, %c0_1] : memref<40x128xf32, #tpu.memory_space<vmem>>, vector<1x32xf32>
    %c33 = arith.constant 33 : index
    %c0_2 = arith.constant 0 : index
    %2 = vector.load %arg2[%c33, %c0_2] : memref<40x128xf32, #tpu.memory_space<vmem>>, vector<1x128xf32>
    %c0_3 = arith.constant 0 : index
    %c0_4 = arith.constant 0 : index
    %3 = vector.load %arg0[%c0_3, %c0_4] : memref<2x1024xbf16, #tpu.memory_space<vmem>>, vector<2x1024xbf16>
    %c0_5 = arith.constant 0 : index
    %c0_6 = arith.constant 0 : index
    %4 = vector.load %arg1[%c0_5, %c0_6] : memref<1024x32xbf16, #tpu.memory_space<vmem>>, vector<1024x32xbf16>
    %cst = arith.constant dense<0.000000e+00> : vector<2x32xf32>
    %5 = tpu.matmul %3, %4, %cst {dimension_numbers = #tpu.dot_dimension_numbers<[1], [0], [0], [1], [0, 0, 1, 1], [], []>} : vector<2x1024xbf16>, vector<1024x32xbf16>, vector<2x32xf32> -> vector<2x32xf32>
    %6 = vector.broadcast %1 : vector<1x32xf32> to vector<2x32xf32>
    %7 = arith.addf %5, %6 : vector<2x32xf32>
    %cst_7 = arith.constant 0.000000e+00 : f32
    %8 = vector.broadcast %cst_7 : f32 to vector<2x32xf32>
    %9 = arith.maximumf %7, %8 : vector<2x32xf32>
    %cst_8 = arith.constant dense<0.000000e+00> : vector<2x128xf32>
    %10 = tpu.matmul %9, %0, %cst_8 {dimension_numbers = #tpu.dot_dimension_numbers<[1], [0], [0], [1], [0, 0, 1, 1], [], []>} : vector<2x32xf32>, vector<32x128xf32>, vector<2x128xf32> -> vector<2x128xf32>
    %11 = vector.broadcast %2 : vector<1x128xf32> to vector<2x128xf32>
    %12 = arith.addf %10, %11 : vector<2x128xf32>
    %c0_9 = arith.constant 0 : index
    %c0_10 = arith.constant 0 : index
    %13 = vector.load %arg3[%c0_9, %c0_10] : memref<2x128xf32, #tpu.memory_space<vmem>>, vector<2x128xf32>
    tpu.vector_store %arg3[%c0_9, %c0_10], %12 {strides = array<i32>} : memref<2x128xf32, #tpu.memory_space<vmem>>, vector<2x128xf32>,
    return
  }
}

</mosaic_0001>

<bundles_post_ra>
// kernel: pose_model_forward.1
= control target key start
LH: loop header
LB: loop body
LE: loop exit
PB: predicated region body
PF: predicated region fallthrough
CT: control target
= control target key end

     0   :  { %s1287_s0 = inlined_call_operand.vmem [shape: bf16[2,1024], index: 0, kind: input, shape index: {}]   ;;  %s1288_s1 = inlined_call_operand.vmem [shape: bf16[1024,32], index: 1, kind: input, shape index: {}]   ;;  %s1289_s2 = inlined_call_operand.vmem [shape: f32[40,128], index: 2, kind: input, shape index: {}]   ;;  %s1290_s3 = inlined_call_operand.hbm [shape: f32[2,128], index: 3, kind: output, shape index: {}]  }
   0x1   :  { %v964_v0 = vld [vmem:[%s1288_s1 + $0x38] sm:$0xff]  ;;  %v963_v4 = vld [vmem:[%s1288_s1 + $0x30] sm:$0xff]  ;;  %v962_v8 = vld [vmem:[%s1288_s1 + $0x28] sm:$0xff] }
   0x2   :  { %v972_v1 = vld [vmem:[%s1288_s1 + $0x78] sm:$0xff]  ;;  %553 = vmatpush.bf16.msra.mxu0 %v964_v0  ;;  %v971_v5 = vld [vmem:[%s1288_s1 + $0x70] sm:$0xff]  ;;  %v970_v9 = vld [vmem:[%s1288_s1 + $0x68] sm:$0xff] }
   0x3   :  { %v980_v2 = vld [vmem:[%s1288_s1 + $0xb8] sm:$0xff]  ;;  %566 = vmatpush.bf16.msra.mxu1 %v972_v1  ;;  %v979_v6 = vld [vmem:[%s1288_s1 + $0xb0] sm:$0xff]  ;;  %v978_v10 = vld [vmem:[%s1288_s1 + $0xa8] sm:$0xff] }
   0x4   :  { %v988_v3 = vld [vmem:[%s1288_s1 + $0xf8] sm:$0xff]  ;;  %579 = vmatpush.bf16.msra.mxu2 %v980_v2  ;;  %v987_v7 = vld [vmem:[%s1288_s1 + $0xf0] sm:$0xff]  ;;  %v986_v11 = vld [vmem:[%s1288_s1 + $0xe8] sm:$0xff] }
   0x5   :  { %592 = vmatpush.bf16.msra.mxu3 %v988_v3  ;;  %v961_v12 = vld [vmem:[%s1288_s1 + $0x20] sm:$0xff]  ;;  %v960_v17 = vld [vmem:[%s1288_s1 + $0x18] sm:$0xff]  ;;  %v959_v21 = vld [vmem:[%s1288_s1 + $0x10] sm:$0xff] }
   0x6   :  { %554 = vmatpush.bf16.msra.mxu0 %v963_v4  ;;  %v969_v13 = vld [vmem:[%s1288_s1 + $0x60] sm:$0xff]  ;;  %v968_v18 = vld [vmem:[%s1288_s1 + $0x58] sm:$0xff]  ;;  %v967_v22 = vld [vmem:[%s1288_s1 + $0x50] sm:$0xff] }
   0x7   :  { %567 = vmatpush.bf16.msra.mxu1 %v971_v5  ;;  %v977_v14 = vld [vmem:[%s1288_s1 + $0xa0] sm:$0xff]  ;;  %v976_v19 = vld [vmem:[%s1288_s1 + $0x98] sm:$0xff] }
   0x8   :  { %580 = vmatpush.bf16.msra.mxu2 %v979_v6  ;;  %v985_v15 = vld [vmem:[%s1288_s1 + $0xe0] sm:$0xff]  ;;  %v984_v20 = vld [vmem:[%s1288_s1 + $0xd8] sm:$0xff] }
   0x9   :  { %593 = vmatpush.bf16.msra.mxu3 %v987_v7  ;;  %v21_v16 = vld [vmem:[%s1287_s0] sm:$0xff] }
   0xa   :  { %555 = vmatpush.bf16.msra.mxu0 %v962_v8  ;;  %152 = vst [vmem:[#allocation1] ss:$9 sm:$0xff] %v21_v16 }
   0xb   :  { %568 = vmatpush.bf16.msra.mxu1 %v970_v9 }
   0xc   :  { %581 = vmatpush.bf16.msra.mxu2 %v978_v10 }
   0xd   :  { %594 = vmatpush.bf16.msra.mxu3 %v986_v11 }
   0xe   :  { %556 = vmatpush.bf16.msra.mxu0 %v961_v12 }
   0xf   :  { %569 = vmatpush.bf16.msra.mxu1 %v969_v13 }
  0x10   :  { %582 = vmatpush.bf16.msra.mxu2 %v977_v14 }
  0x11   :  { %595 = vmatpush.bf16.msra.mxu3 %v985_v15 }
  0x12   :  { %557 = vmatpush.bf16.msra.mxu0 %v960_v17 }
  0x13   :  { %570 = vmatpush.bf16.msra.mxu1 %v968_v18 }
  0x14   :  { %8 = vsyncpa [#allocation3], 0  ;;  %583 = vmatpush.bf16.msra.mxu2 %v976_v19  ;;  %v975_v23 = vld [vmem:[%s1288_s1 + $0x90] sm:$0xff]  ;;  %v958_v25 = vld [vmem:[%s1288_s1 + $0x8] sm:$0xff]  ;;  %vm659_vm0 = vcmask 261120   ;;  %s1050_s14 = smov [#allocation2]  }
  0x15   :  { %596 = vmatpush.bf16.msra.mxu3 %v984_v20  ;;  %v983_v24 = vld [vmem:[%s1288_s1 + $0xd0] sm:$0xff]  ;;  %v966_v26 = vld [vmem:[%s1288_s1 + $0x48] sm:$0xff]  ;;  %v957_v29 = vld [vmem:[%s1288_s1] sm:$0xff]  ;;  %s689_s15 = sshll.u32 %s1050_s14, 4  ;;  %s691_s18 = sshll.u32 %s1290_s3, 4  ;;  %s690_s15 = int_to_ptr.vmem [resolvable:$true] %s689_s15  ;;  %s692_s18 = int_to_ptr.hbm [resolvable:$true] %s691_s18 }
  0x16   :  { %558 = vmatpush.bf16.msra.mxu0 %v959_v21  ;;  %v974_v27 = vld [vmem:[%s1288_s1 + $0x88] sm:$0xff]  ;;  %v965_v30 = vld [vmem:[%s1288_s1 + $0x40] sm:$0xff]  ;;  %v996_v33 = vld [vmem:[%s1288_s1 + $0x138] sm:$0xff] }
  0x17   :  { %571 = vmatpush.bf16.msra.mxu1 %v967_v22  ;;  %v982_v28 = vld [vmem:[%s1288_s1 + $0xc8] sm:$0xff]  ;;  %v973_v31 = vld [vmem:[%s1288_s1 + $0x80] sm:$0xff]  ;;  %v1004_v34 = vld [vmem:[%s1288_s1 + $0x178] sm:$0xff] }
  0x18   :  { %584 = vmatpush.bf16.msra.mxu2 %v975_v23  ;;  %v981_v32 = vld [vmem:[%s1288_s1 + $0xc0] sm:$0xff]  ;;  %v1012_v35 = vld [vmem:[%s1288_s1 + $0x1b8] sm:$0xff]  ;;  %v995_v37 = vld [vmem:[%s1288_s1 + $0x130] sm:$0xff] }
  0x19   :  { %597 = vmatpush.bf16.msra.mxu3 %v983_v24  ;;  %v1020_v36 = vld [vmem:[%s1288_s1 + $0x1f8] sm:$0xff]  ;;  %v153_v39 = vld [vmem:[#allocation1] sm:$0xff]  ;;  %v1003_v40 = vld [vmem:[%s1288_s1 + $0x170] sm:$0xff] }
  0x1a   :  { %559 = vmatpush.bf16.msra.mxu0 %v958_v25  ;;  %v155_v38 = vld [vmem:[#allocation1 + $0x12] sm:$0xff]  ;;  %v156_v41 = vld [vmem:[#allocation1 + $0x1b] sm:$0xff]  ;;  %v154_v42 = vld [vmem:[#allocation1 + $0x9] sm:$0xff] }
  0x1b   :  { %572 = vmatpush.bf16.msra.mxu1 %v966_v26  ;;  %v1011_v43 = vld [vmem:[%s1288_s1 + $0x1b0] sm:$0xff]  ;;  %v994_v45 = vld [vmem:[%s1288_s1 + $0x128] sm:$0xff]  ;;  %v993_v49 = vld [vmem:[%s1288_s1 + $0x120] sm:$0xff] }
  0x1c   :  { %585 = vmatpush.bf16.msra.mxu2 %v974_v27  ;;  %v1019_v44 = vld [vmem:[%s1288_s1 + $0x1f0] sm:$0xff]  ;;  %v1002_v46 = vld [vmem:[%s1288_s1 + $0x168] sm:$0xff]  ;;  %v1001_v50 = vld [vmem:[%s1288_s1 + $0x160] sm:$0xff] }
  0x1d   :  { %598 = vmatpush.bf16.msra.mxu3 %v982_v28  ;;  %v1010_v47 = vld [vmem:[%s1288_s1 + $0x1a8] sm:$0xff]  ;;  %v1009_v51 = vld [vmem:[%s1288_s1 + $0x1a0] sm:$0xff]  ;;  %v992_v53 = vld [vmem:[%s1288_s1 + $0x118] sm:$0xff] }
  0x1e   :  { %560 = vmatpush.bf16.msra.mxu0 %v957_v29  ;;  %v1018_v48 = vld [vmem:[%s1288_s1 + $0x1e8] sm:$0xff]  ;;  %v1017_v52 = vld [vmem:[%s1288_s1 + $0x1e0] sm:$0xff]  ;;  %v1000_v54 = vld [vmem:[%s1288_s1 + $0x158] sm:$0xff] }
  0x1f   :  { %573 = vmatpush.bf16.msra.mxu1 %v965_v30  ;;  %v1008_v55 = vld [vmem:[%s1288_s1 + $0x198] sm:$0xff]  ;;  %v991_v57 = vld [vmem:[%s1288_s1 + $0x110] sm:$0xff]  ;;  %v990_v61 = vld [vmem:[%s1288_s1 + $0x108] sm:$0xff] }
  0x20   :  { %586 = vmatpush.bf16.msra.mxu2 %v973_v31  ;;  %v1016_v56 = vld [vmem:[%s1288_s1 + $0x1d8] sm:$0xff]  ;;  %v999_v58 = vld [vmem:[%s1288_s1 + $0x150] sm:$0xff]  ;;  %v998_v62 = vld [vmem:[%s1288_s1 + $0x148] sm:$0xff] }
  0x21   :  { %599 = vmatpush.bf16.msra.mxu3 %v981_v32  ;;  %561 = vmatmul.bf16.vlgmr.msra.gmra.mxu0 %v153_v39  ;;  %v1007_v59 = vld [vmem:[%s1288_s1 + $0x190] sm:$0xff]  ;;  %v1006_v63 = vld [vmem:[%s1288_s1 + $0x188] sm:$0xff]  ;;  %v989_v1 = vld [vmem:[%s1288_s1 + $0x100] sm:$0xff] }
  0x22   :  { %605 = vmatpush.bf16.msrb.mxu0 %v996_v33  ;;  %574 = vmatmul.bf16.vlgmr.msra.gmra.mxu1 %v154_v42  ;;  %v1015_v60 = vld [vmem:[%s1288_s1 + $0x1d0] sm:$0xff]  ;;  %v1014_v0 = vld [vmem:[%s1288_s1 + $0x1c8] sm:$0xff]  ;;  %v997_v2 = vld [vmem:[%s1288_s1 + $0x140] sm:$0xff] }
  0x23   :  { %618 = vmatpush.bf16.msrb.mxu1 %v1004_v34  ;;  %587 = vmatmul.bf16.vlgmr.msra.gmra.mxu2 %v155_v38  ;;  %v1005_v3 = vld [vmem:[%s1288_s1 + $0x180] sm:$0xff]  ;;  %v158_v6 = vld [vmem:[#allocation1 + $0x2d] sm:$0xff]  ;;  %v159_v7 = vld [vmem:[#allocation1 + $0x36] sm:$0xff] }
  0x24   :  { %631 = vmatpush.bf16.msrb.mxu2 %v1012_v35  ;;  %600 = vmatmul.bf16.vlgmr.msra.gmra.mxu3 %v156_v41  ;;  %v1013_v4 = vld [vmem:[%s1288_s1 + $0x1c0] sm:$0xff]  ;;  %v18_v9 = vld [vmem:[%s1289_s2 + $0x18] sm:$0xff]  ;;  %v17_v11 = vld [vmem:[%s1289_s2 + $0x10] sm:$0xff] }
  0x25   :  { %644 = vmatpush.bf16.msrb.mxu3 %v1020_v36  ;;  %v157_v5 = vld [vmem:[#allocation1 + $0x24] sm:$0xff]  ;;  %v1022_v19 = vld [vmem:[%s1289_s2 + $0x20] ss:$0 sm:$0xff]  ;;  %v1023_v39 = vld [vmem:[%s1289_s2 + $0x21] ss:$0 sm:$0xff] }
  0x26   :  { %606 = vmatpush.bf16.msrb.mxu0 %v995_v37  ;;  %v160_v8 = vld [vmem:[#allocation1 + $0x3f] sm:$0xff]  ;;  %v16_v12 = vld [vmem:[%s1289_s2 + $0x8] sm:$0xff] }
  0x27   :  { %619 = vmatpush.bf16.msrb.mxu1 %v1003_v40  ;;  %v15_v18 = vld [vmem:[%s1289_s2] sm:$0xff] }
  0x28   :  { %632 = vmatpush.bf16.msrb.mxu2 %v1011_v43 }
  0x29   :  { %645 = vmatpush.bf16.msrb.mxu3 %v1019_v44 }
  0x2a   :  { %607 = vmatpush.bf16.msrb.mxu0 %v994_v45 }
  0x2b   :  { %620 = vmatpush.bf16.msrb.mxu1 %v1002_v46 }
  0x2c   :  { %633 = vmatpush.bf16.msrb.mxu2 %v1010_v47 }
  0x2d   :  { %646 = vmatpush.bf16.msrb.mxu3 %v1018_v48 }
  0x2e   :  { %608 = vmatpush.bf16.msrb.mxu0 %v993_v49 }
  0x2f   :  { %621 = vmatpush.bf16.msrb.mxu1 %v1001_v50 }
  0x30   :  { %634 = vmatpush.bf16.msrb.mxu2 %v1009_v51 }
  0x31   :  { %647 = vmatpush.bf16.msrb.mxu3 %v1017_v52 }
  0x32   :  { %609 = vmatpush.bf16.msrb.mxu0 %v992_v53 }
  0x33   :  { %622 = vmatpush.bf16.msrb.mxu1 %v1000_v54 }
  0x34   :  { %635 = vmatpush.bf16.msrb.mxu2 %v1008_v55 }
  0x35   :  { %648 = vmatpush.bf16.msrb.mxu3 %v1016_v56 }
  0x36   :  { %610 = vmatpush.bf16.msrb.mxu0 %v991_v57 }
  0x37   :  { %623 = vmatpush.bf16.msrb.mxu1 %v999_v58 }
  0x38   :  { %636 = vmatpush.bf16.msrb.mxu2 %v1007_v59 }
  0x39   :  { %649 = vmatpush.bf16.msrb.mxu3 %v1015_v60 }
  0x3a   :  { %611 = vmatpush.bf16.msrb.mxu0 %v990_v61 }
  0x3b   :  { %624 = vmatpush.bf16.msrb.mxu1 %v998_v62 }
  0x3c   :  { %637 = vmatpush.bf16.msrb.mxu2 %v1006_v63 }
  0x3d   :  { %650 = vmatpush.bf16.msrb.mxu3 %v1014_v0 }
  0x3e   :  { %612 = vmatpush.bf16.msrb.mxu0 %v989_v1 }
  0x3f   :  { %625 = vmatpush.bf16.msrb.mxu1 %v997_v2 }
  0x40   :  { %638 = vmatpush.bf16.msrb.mxu2 %v1005_v3 }
  0x41   :  { %651 = vmatpush.bf16.msrb.mxu3 %v1013_v4  ;;  %613 = vmatmul.bf16.vlgmr.msrb.gmra.mxu0 %v157_v5 }
  0x42   :  { %626 = vmatmul.bf16.vlgmr.msrb.gmra.mxu1 %v158_v6  ;;  %675 = vmatpush.msra.mxu0 %v18_v9 }
  0x43   :  { %639 = vmatmul.bf16.vlgmr.msrb.gmra.mxu2 %v159_v7 }
  0x44   :  { %652 = vmatmul.bf16.vlgmr.msrb.gmra.mxu3 %v160_v8  ;;  %676 = vmatpush.msra.mxu0 %v17_v11 }
  0x46   :  { %677 = vmatpush.msra.mxu0 %v16_v12 }
  0x48   :  { %678 = vmatpush.msra.mxu0 %v15_v18 }
  0x9e   :  { %v562_v10 = vpop.f32.mrf.mxu0 }
  0x9f   :  { %v575_v13 = vpop.f32.mrf.mxu1  ;;  %v563_v22 = vadd.f32 %v1022_v19, %v562_v10 }
  0xa1   :  { %v576_v23 = vadd.f32 %v575_v13, %v563_v22 }
  0xa6   :  { %v588_v14 = vpop.f32.mrf.mxu2  ;;  %v564_v16 = vpop.f32.mrf.mxu0 }
  0xa7   :  { %v601_v15 = vpop.f32.mrf.mxu3  ;;  %v577_v17 = vpop.f32.mrf.mxu1  ;;  %v589_v24 = vadd.f32 %v588_v14, %v576_v23 }
  0xa9   :  { %v602_v25 = vadd.f32 %v601_v15, %v589_v24 }
  0xae   :  { %v590_v20 = vpop.f32.mrf.mxu2 }
  0xaf   :  { %v603_v21 = vpop.f32.mrf.mxu3 }
  0xbe   :  { %v614_v26 = vpop.f32.mrf.mxu0 }
  0xbf   :  { %v627_v27 = vpop.f32.mrf.mxu1  ;;  %v615_v28 = vadd.f32 %v614_v26, %v602_v25 }
  0xc1   :  { %v628_v29 = vadd.f32 %v627_v27, %v615_v28 }
  0xc6   :  { %v640_v30 = vpop.f32.mrf.mxu2  ;;  %v616_v33 = vpop.f32.mrf.mxu0 }
  0xc7   :  { %v653_v31 = vpop.f32.mrf.mxu3  ;;  %v641_v32 = vadd.f32 %v640_v30, %v628_v29  ;;  %v629_v34 = vpop.f32.mrf.mxu1 }
  0xc9   :  { %v654_v35 = vadd.f32 %v653_v31, %v641_v32 }
  0xcb   :  { %v657_v36 = vmax.f32 %v654_v35, 0.0 }
  0xcd   :  { %956 = vmatmul.msk.f32.vlgmr.msra.gmra.mxu0 %vm659_vm0, %v657_v36 }
  0xce   :  { %v642_v37 = vpop.f32.mrf.mxu2 }
  0xcf   :  { %v655_v38 = vpop.f32.mrf.mxu3 }
 0x14a   :  { %v680_v40 = vpop.f32.mrf.mxu0 }
 0x14b   :  { %v681_v41 = vadd.f32 %v1023_v39, %v680_v40 }
 0x14d   :  { %683 = vst [vmem:[#allocation2] sm:$0x3] %v681_v41 }
 0x14e   :  { %694 = dma.vmem_to_hbm [thread:$0]  %s690_s15, 32, %s692_s18, [#allocation3]  }
 0x14f   :  { %1048 = dma.done.wait [#allocation3], 32  }
 0x150   :  { %1049 = vsyncadd [#allocation3], 4294967264 }
 0x151   :  { %699 = vsyncpa [#allocation3], 1 }

</bundles_post_ra>
